<compile_context>
chip_gen: v6e
topology: v6e:2x2x1
jax: 0.10.0
libtpu: 0.0.40
codegen_flags: <defaults>
</compile_context>

<pallas_src>
import functools

import jax
import jax.numpy as jnp
from jax.experimental import pallas as pl
from jax.experimental.pallas import tpu as pltpu

_LANE = 128
_SUB = 8
_BLOCK_BUDGET_BYTES = 6 << 20   # logits bytes per grid step (~85-90% of HBM roofline)


def _focal_loss_kernel(logits_ref, tgt_ref, out_ref, *, alpha, gamma,
                       ignore_index, valid_rows):
    _, C, TR, L = logits_ref.shape            # block: (1, C, TR, 128)
    t = tgt_ref[0]                            # (TR, 128) int32

    # Ragged-tail mask: global row id < true row count. Handles rows % TR != 0
    # without any wrapper-side padding of the logits (OOB rows read garbage that
    # is fully masked below, including any NaN/Inf it may produce).
    row0 = pl.program_id(1) * TR
    row_ids = row0 + jax.lax.broadcasted_iota(jnp.int32, (TR, L), 0)
    live = jnp.logical_and(row_ids < valid_rows, t != ignore_index)

    # Class-wise max: C-1 elementwise maxes over dense (TR,128) tiles (VPU only).
    m = logits_ref[0, 0].astype(jnp.float32)
    for c in range(1, C):
        m = jnp.maximum(m, logits_ref[0, c].astype(jnp.float32))

    # One unrolled pass over the small static C: sum of exp, plus one-hot gathers
    # of exp(x_t - m) (for pt) and x_t (for ce).
    s = jnp.zeros_like(m)
    e_t = jnp.zeros_like(m)
    x_t = jnp.zeros_like(m)
    for c in range(C):
        xc = logits_ref[0, c].astype(jnp.float32)
        e = jnp.exp(xc - m)
        s = s + e
        hit = t == c
        e_t = e_t + jnp.where(hit, e, 0.0)
        x_t = x_t + jnp.where(hit, xc, 0.0)

    ce = m + jnp.log(s) - x_t                 # log-sum-exp minus target logit
    ce = jnp.maximum(ce, 0.0)                 # guard tiny negative ulps
    ce = jnp.where(live, ce, 0.0)             # ignored / out-of-range rows -> 0

    # pt = exp(-ce) == e_t / s : reuse the exps already on hand instead of issuing
    # another EUP exp.  Exact divide keeps the 1e-5 rtol vs the reference.
    pt = e_t / s
    w = 1.0 - pt
    ig = int(gamma)
    if float(gamma) == float(ig) and ig >= 0:
        # Integer gamma -> repeated multiply (gamma=2: w*w), no pow lowering.
        ft = jnp.ones_like(w) if ig == 0 else w
        for _ in range(ig - 1):
            ft = ft * w
    else:
        ft = jnp.maximum(w, 0.0) ** gamma     # clamp base for float pow
    focal = alpha * ft * ce                   # (TR, 128)
    focal = jnp.where(live, focal, 0.0)       # also kills NaN from garbage OOB rows

    # Fold sublane groups (TR,128) -> (8,128): tile-aligned reshape + VPU adds.
    if TR % _SUB == 0 and TR > _SUB:
        out_ref[0, 0] = jnp.sum(focal.reshape(TR // _SUB, _SUB, L), axis=0)
    else:
        out_ref[0, 0] = focal


def focal_loss(inputs, targets, *, alpha=0.5, gamma=2, ignore_index=0):
    """inputs: (N, C, *spatial) float logits; targets: (N, *spatial) int ids."""
    C = inputs.shape[1]

    if inputs.ndim == 2:
        # Classification layout (N, C): only case needing a (small) transpose.
        x3 = jnp.transpose(inputs)[None]                      # (1, C, N)
        t3 = targets.reshape(1, -1).astype(jnp.int32)         # (1, N)
    else:
        # Segmentation layout (N, C, *spatial): already class-leading per image,
        # so these reshapes are free — no extra HBM pass over the logits.
        x3 = inputs.reshape(inputs.shape[0], C, -1)           # (N, C, P)
        t3 = targets.reshape(targets.shape[0], -1).astype(jnp.int32)

    B, _, P = x3.shape
    m_true = targets.size                                     # focal.mean() denominator

    # Lane padding only if the per-image pixel count isn't a multiple of 128
    # (padded pixels get ignore_index targets and contribute 0).
    if P % _LANE != 0:
        pad = _LANE * pl.cdiv(P, _LANE) - P
        x3 = jnp.pad(x3, ((0, 0), (0, 0), (0, pad)))
        t3 = jnp.pad(t3, ((0, 0), (0, pad)), constant_values=ignore_index)
        P = P + pad

    rows = P // _LANE
    isz = jnp.dtype(x3.dtype).itemsize

    # Row tile: multiple of 8 sized by the per-step block budget, never larger
    # than the row extent (so blocks never exceed the array dims); split so the
    # parallel grid has >= 2 cells for v7x's two TensorCores when possible.
    if rows < _SUB:
        tr = rows
    else:
        rows8 = (rows // _SUB) * _SUB
        tr_cap = max(_SUB, (_BLOCK_BUDGET_BYTES // (C * _LANE * isz)) // _SUB * _SUB)
        tr = min(tr_cap, rows8)
        if B * pl.cdiv(rows, tr) < 2 and rows8 >= 2 * _SUB:
            tr = min(tr, ((rows8 // 2) // _SUB) * _SUB)
    n_chunks = pl.cdiv(rows, tr)
    out_sub = _SUB if tr % _SUB == 0 else tr

    x4 = x3.reshape(B, C, rows, _LANE)        # free reshapes (contiguous)
    t4 = t3.reshape(B, rows, _LANE)

    kernel = functools.partial(
        _focal_loss_kernel,
        alpha=float(alpha), gamma=float(gamma),
        ignore_index=int(ignore_index), valid_rows=int(rows))

    # Explicit scoped-VMEM budget: 2x double-buffered blocks + headroom (fits the
    # bigger 6 MiB tiles under v5e's 16 MiB default and v7x's 64 MiB physical).
    lblk = C * tr * _LANE * isz
    tblk = tr * _LANE * 4
    oblk = out_sub * _LANE * 4
    vmem_limit = int(2 * (lblk + tblk + oblk) + (4 << 20))

    elems = B * n_chunks * tr * _LANE
    cost = pl.CostEstimate(
        flops=int((10 * C + 12) * elems),
        transcendentals=int((C + 1) * elems),
        bytes_accessed=int((C * isz + 4) * elems + B * n_chunks * oblk),
    )

    partial_sums = pl.pallas_call(
        kernel,
        out_shape=jax.ShapeDtypeStruct((B, n_chunks, out_sub, _LANE), jnp.float32),
        grid_spec=pltpu.PrefetchScalarGridSpec(
            num_scalar_prefetch=0,
            grid=(B, n_chunks),
            in_specs=[
                pl.BlockSpec((1, C, tr, _LANE), lambda n, i: (n, 0, i, 0)),
                pl.BlockSpec((1, tr, _LANE), lambda n, i: (n, i, 0)),
            ],
            out_specs=pl.BlockSpec((1, 1, out_sub, _LANE), lambda n, i: (n, i, 0, 0)),
        ),
        compiler_params=pltpu.CompilerParams(
            dimension_semantics=("parallel", "parallel"),
            vmem_limit_bytes=vmem_limit),
        cost_estimate=cost,
    )(x4, t4)

    # Tiny final reduction + mean over the TRUE element count (ignored and padded
    # positions contribute 0 to the numerator but count in the denominator,
    # exactly like focal_loss.mean() in the PyTorch module).
    return jnp.sum(partial_sums) / jnp.float32(m_true)


def _focal_loss_ref(inputs, targets, *, alpha=0.5, gamma=2, ignore_index=0):
    """Pure-JAX reference mirroring the PyTorch module."""
    C = inputs.shape[1]
    x = jnp.moveaxis(inputs, 1, -1).reshape(-1, C).astype(jnp.float32)
    t = targets.reshape(-1).astype(jnp.int32)
    logp = jax.nn.log_softmax(x, axis=-1)
    ce = -jnp.take_along_axis(logp, t[:, None], axis=-1)[:, 0]
    ce = jnp.where(t == ignore_index, 0.0, ce)
    pt = jnp.exp(-ce)
    focal = alpha * (1.0 - pt) ** gamma * ce
    return jnp.mean(focal)


if __name__ == "__main__":
    key = jax.random.PRNGKey(0)
    k1, k2 = jax.random.split(key)
    # Segmentation-style shapes: logits (N, C, H, W), targets (N, H, W).
    N, C, H, W = 2, 4, 16, 16
    inputs = jax.random.normal(k1, (N, C, H, W), dtype=jnp.float32)
    targets = jax.random.randint(k2, (N, H, W), 0, C, dtype=jnp.int32)

    loss = focal_loss(inputs, targets, alpha=0.5, gamma=2, ignore_index=0)
    loss = jax.block_until_ready(loss)

    ref = _focal_loss_ref(inputs, targets, alpha=0.5, gamma=2, ignore_index=0)
    assert jnp.allclose(loss, ref, rtol=1e-5, atol=1e-6), (loss, ref)

    print("KERNEL_OK")
</pallas_src>

<mosaic_0001>
module attributes {stable_mosaic.version = 11 : i64} {
  func.func @_focal_loss_kernel(%arg0: i32, %arg1: i32, %arg2: memref<1x4x2x128xf32, #tpu.memory_space<vmem>>, %arg3: memref<1x2x128xi32, #tpu.memory_space<vmem>>, %arg4: memref<1x1x2x128xf32, #tpu.memory_space<vmem>>) attributes {dimension_semantics = [#tpu.dimension_semantics<parallel>, #tpu.dimension_semantics<parallel>], iteration_bounds = array<i64: 2, 1>, scalar_prefetch = 0 : i64, scratch_operands = 0 : i64, tpu.core_type = #tpu.core_type<tc>, window_params = [{transform_indices = @transform_0, window_bounds = array<i64: 1, 4, 2, 128>}, {transform_indices = @transform_1, window_bounds = array<i64: 1, 2, 128>}, {transform_indices = @transform_2, window_bounds = array<i64: 1, 1, 2, 128>}]} {
    %c0 = arith.constant 0 : index
    %c0_0 = arith.constant 0 : index
    %c0_1 = arith.constant 0 : index
    %0 = vector.load %arg3[%c0, %c0_0, %c0_1] : memref<1x2x128xi32, #tpu.memory_space<vmem>>, vector<1x2x128xi32>
    %1 = vector.shape_cast %0 : vector<1x2x128xi32> to vector<2x128xi32>
    %c2_i32 = arith.constant 2 : i32
    %2 = arith.muli %arg1, %c2_i32 : i32
    %3 = tpu.iota {dimensions = array<i32: 0>} : vector<2x128xi32>
    %4 = vector.broadcast %2 : i32 to vector<2x128xi32>
    %5 = arith.addi %4, %3 : vector<2x128xi32>
    %c2_i32_2 = arith.constant 2 : i32
    %6 = vector.broadcast %c2_i32_2 : i32 to vector<2x128xi32>
    %7 = arith.cmpi slt, %5, %6 : vector<2x128xi32>
    %c0_i32 = arith.constant 0 : i32
    %8 = vector.broadcast %c0_i32 : i32 to vector<2x128xi32>
    %9 = arith.cmpi ne, %1, %8 : vector<2x128xi32>
    %10 = arith.andi %7, %9 : vector<2x128xi1>
    %c0_3 = arith.constant 0 : index
    %c0_4 = arith.constant 0 : index
    %c0_5 = arith.constant 0 : index
    %c0_6 = arith.constant 0 : index
    %11 = vector.load %arg2[%c0_3, %c0_4, %c0_5, %c0_6] : memref<1x4x2x128xf32, #tpu.memory_space<vmem>>, vector<1x1x2x128xf32>
    %12 = vector.shape_cast %11 : vector<1x1x2x128xf32> to vector<2x128xf32>
    %c0_7 = arith.constant 0 : index
    %c1 = arith.constant 1 : index
    %c0_8 = arith.constant 0 : index
    %c0_9 = arith.constant 0 : index
    %13 = vector.load %arg2[%c0_7, %c1, %c0_8, %c0_9] : memref<1x4x2x128xf32, #tpu.memory_space<vmem>>, vector<1x1x2x128xf32>
    %14 = vector.shape_cast %13 : vector<1x1x2x128xf32> to vector<2x128xf32>
    %15 = arith.maximumf %12, %14 : vector<2x128xf32>
    %c0_10 = arith.constant 0 : index
    %c2 = arith.constant 2 : index
    %c0_11 = arith.constant 0 : index
    %c0_12 = arith.constant 0 : index
    %16 = vector.load %arg2[%c0_10, %c2, %c0_11, %c0_12] : memref<1x4x2x128xf32, #tpu.memory_space<vmem>>, vector<1x1x2x128xf32>
    %17 = vector.shape_cast %16 : vector<1x1x2x128xf32> to vector<2x128xf32>
    %18 = arith.maximumf %15, %17 : vector<2x128xf32>
    %c0_13 = arith.constant 0 : index
    %c3 = arith.constant 3 : index
    %c0_14 = arith.constant 0 : index
    %c0_15 = arith.constant 0 : index
    %19 = vector.load %arg2[%c0_13, %c3, %c0_14, %c0_15] : memref<1x4x2x128xf32, #tpu.memory_space<vmem>>, vector<1x1x2x128xf32>
    %20 = vector.shape_cast %19 : vector<1x1x2x128xf32> to vector<2x128xf32>
    %21 = arith.maximumf %18, %20 : vector<2x128xf32>
    %cst = arith.constant 0.000000e+00 : f32
    %22 = vector.broadcast %cst : f32 to vector<2x128xf32>
    %cst_16 = arith.constant 0.000000e+00 : f32
    %23 = vector.broadcast %cst_16 : f32 to vector<2x128xf32>
    %cst_17 = arith.constant 0.000000e+00 : f32
    %24 = vector.broadcast %cst_17 : f32 to vector<2x128xf32>
    %c0_18 = arith.constant 0 : index
    %c0_19 = arith.constant 0 : index
    %c0_20 = arith.constant 0 : index
    %c0_21 = arith.constant 0 : index
    %25 = vector.load %arg2[%c0_18, %c0_19, %c0_20, %c0_21] : memref<1x4x2x128xf32, #tpu.memory_space<vmem>>, vector<1x1x2x128xf32>
    %26 = vector.shape_cast %25 : vector<1x1x2x128xf32> to vector<2x128xf32>
    %27 = arith.subf %26, %21 : vector<2x128xf32>
    %28 = math.exp %27 : vector<2x128xf32>
    %29 = arith.addf %22, %28 : vector<2x128xf32>
    %c0_i32_22 = arith.constant 0 : i32
    %30 = vector.broadcast %c0_i32_22 : i32 to vector<2x128xi32>
    %31 = arith.cmpi eq, %1, %30 : vector<2x128xi32>
    %cst_23 = arith.constant 0.000000e+00 : f32
    %32 = vector.broadcast %cst_23 : f32 to vector<2x128xf32>
    %33 = arith.select %31, %28, %32 : vector<2x128xi1>, vector<2x128xf32>
    %34 = arith.addf %23, %33 : vector<2x128xf32>
    %cst_24 = arith.constant 0.000000e+00 : f32
    %35 = vector.broadcast %cst_24 : f32 to vector<2x128xf32>
    %36 = arith.select %31, %26, %35 : vector<2x128xi1>, vector<2x128xf32>
    %37 = arith.addf %24, %36 : vector<2x128xf32>
    %c0_25 = arith.constant 0 : index
    %c1_26 = arith.constant 1 : index
    %c0_27 = arith.constant 0 : index
    %c0_28 = arith.constant 0 : index
    %38 = vector.load %arg2[%c0_25, %c1_26, %c0_27, %c0_28] : memref<1x4x2x128xf32, #tpu.memory_space<vmem>>, vector<1x1x2x128xf32>
    %39 = vector.shape_cast %38 : vector<1x1x2x128xf32> to vector<2x128xf32>
    %40 = arith.subf %39, %21 : vector<2x128xf32>
    %41 = math.exp %40 : vector<2x128xf32>
    %42 = arith.addf %29, %41 : vector<2x128xf32>
    %c1_i32 = arith.constant 1 : i32
    %43 = vector.broadcast %c1_i32 : i32 to vector<2x128xi32>
    %44 = arith.cmpi eq, %1, %43 : vector<2x128xi32>
    %cst_29 = arith.constant 0.000000e+00 : f32
    %45 = vector.broadcast %cst_29 : f32 to vector<2x128xf32>
    %46 = arith.select %44, %41, %45 : vector<2x128xi1>, vector<2x128xf32>
    %47 = arith.addf %34, %46 : vector<2x128xf32>
    %cst_30 = arith.constant 0.000000e+00 : f32
    %48 = vector.broadcast %cst_30 : f32 to vector<2x128xf32>
    %49 = arith.select %44, %39, %48 : vector<2x128xi1>, vector<2x128xf32>
    %50 = arith.addf %37, %49 : vector<2x128xf32>
    %c0_31 = arith.constant 0 : index
    %c2_32 = arith.constant 2 : index
    %c0_33 = arith.constant 0 : index
    %c0_34 = arith.constant 0 : index
    %51 = vector.load %arg2[%c0_31, %c2_32, %c0_33, %c0_34] : memref<1x4x2x128xf32, #tpu.memory_space<vmem>>, vector<1x1x2x128xf32>
    %52 = vector.shape_cast %51 : vector<1x1x2x128xf32> to vector<2x128xf32>
    %53 = arith.subf %52, %21 : vector<2x128xf32>
    %54 = math.exp %53 : vector<2x128xf32>
    %55 = arith.addf %42, %54 : vector<2x128xf32>
    %c2_i32_35 = arith.constant 2 : i32
    %56 = vector.broadcast %c2_i32_35 : i32 to vector<2x128xi32>
    %57 = arith.cmpi eq, %1, %56 : vector<2x128xi32>
    %cst_36 = arith.constant 0.000000e+00 : f32
    %58 = vector.broadcast %cst_36 : f32 to vector<2x128xf32>
    %59 = arith.select %57, %54, %58 : vector<2x128xi1>, vector<2x128xf32>
    %60 = arith.addf %47, %59 : vector<2x128xf32>
    %cst_37 = arith.constant 0.000000e+00 : f32
    %61 = vector.broadcast %cst_37 : f32 to vector<2x128xf32>
    %62 = arith.select %57, %52, %61 : vector<2x128xi1>, vector<2x128xf32>
    %63 = arith.addf %50, %62 : vector<2x128xf32>
    %c0_38 = arith.constant 0 : index
    %c3_39 = arith.constant 3 : index
    %c0_40 = arith.constant 0 : index
    %c0_41 = arith.constant 0 : index
    %64 = vector.load %arg2[%c0_38, %c3_39, %c0_40, %c0_41] : memref<1x4x2x128xf32, #tpu.memory_space<vmem>>, vector<1x1x2x128xf32>
    %65 = vector.shape_cast %64 : vector<1x1x2x128xf32> to vector<2x128xf32>
    %66 = arith.subf %65, %21 : vector<2x128xf32>
    %67 = math.exp %66 : vector<2x128xf32>
    %68 = arith.addf %55, %67 : vector<2x128xf32>
    %c3_i32 = arith.constant 3 : i32
    %69 = vector.broadcast %c3_i32 : i32 to vector<2x128xi32>
    %70 = arith.cmpi eq, %1, %69 : vector<2x128xi32>
    %cst_42 = arith.constant 0.000000e+00 : f32
    %71 = vector.broadcast %cst_42 : f32 to vector<2x128xf32>
    %72 = arith.select %70, %67, %71 : vector<2x128xi1>, vector<2x128xf32>
    %73 = arith.addf %60, %72 : vector<2x128xf32>
    %cst_43 = arith.constant 0.000000e+00 : f32
    %74 = vector.broadcast %cst_43 : f32 to vector<2x128xf32>
    %75 = arith.select %70, %65, %74 : vector<2x128xi1>, vector<2x128xf32>
    %76 = arith.addf %63, %75 : vector<2x128xf32>
    %77 = math.log %68 : vector<2x128xf32>
    %78 = arith.addf %21, %77 : vector<2x128xf32>
    %79 = arith.subf %78, %76 : vector<2x128xf32>
    %cst_44 = arith.constant 0.000000e+00 : f32
    %80 = vector.broadcast %cst_44 : f32 to vector<2x128xf32>
    %81 = arith.maximumf %79, %80 : vector<2x128xf32>
    %cst_45 = arith.constant 0.000000e+00 : f32
    %82 = vector.broadcast %cst_45 : f32 to vector<2x128xf32>
    %83 = arith.select %10, %81, %82 : vector<2x128xi1>, vector<2x128xf32>
    %84 = arith.divf %73, %68 : vector<2x128xf32>
    %cst_46 = arith.constant 1.000000e+00 : f32
    %85 = vector.broadcast %cst_46 : f32 to vector<2x128xf32>
    %86 = arith.subf %85, %84 : vector<2x128xf32>
    %87 = arith.mulf %86, %86 : vector<2x128xf32>
    %cst_47 = arith.constant 5.000000e-01 : f32
    %88 = vector.broadcast %cst_47 : f32 to vector<2x128xf32>
    %89 = arith.mulf %88, %87 : vector<2x128xf32>
    %90 = arith.mulf %89, %83 : vector<2x128xf32>
    %cst_48 = arith.constant 0.000000e+00 : f32
    %91 = vector.broadcast %cst_48 : f32 to vector<2x128xf32>
    %92 = arith.select %10, %90, %91 : vector<2x128xi1>, vector<2x128xf32>
    %c0_49 = arith.constant 0 : index
    %c0_50 = arith.constant 0 : index
    %c0_51 = arith.constant 0 : index
    %c0_52 = arith.constant 0 : index
    %93 = vector.load %arg4[%c0_49, %c0_50, %c0_51, %c0_52] : memref<1x1x2x128xf32, #tpu.memory_space<vmem>>, vector<1x1x2x128xf32>
    %94 = vector.shape_cast %93 : vector<1x1x2x128xf32> to vector<2x128xf32>
    %95 = vector.shape_cast %92 : vector<2x128xf32> to vector<1x1x2x128xf32>
    tpu.vector_store %arg4[%c0_49, %c0_50, %c0_51, %c0_52], %95 {strides = array<i32>} : memref<1x1x2x128xf32, #tpu.memory_space<vmem>>, vector<1x1x2x128xf32>,
    return
  }
  func.func @transform_0(%arg0: i32, %arg1: i32) -> (i32, i32, i32, i32) {
    %c0_i32 = arith.constant 0 : i32
    %c0_i32_0 = arith.constant 0 : i32
    %c0_i32_1 = arith.constant 0 : i32
    return %arg0, %c0_i32, %arg1, %c0_i32_0 : i32, i32, i32, i32
  }
  func.func @transform_1(%arg0: i32, %arg1: i32) -> (i32, i32, i32) {
    %c0_i32 = arith.constant 0 : i32
    %c0_i32_0 = arith.constant 0 : i32
    return %arg0, %arg1, %c0_i32 : i32, i32, i32
  }
  func.func @transform_2(%arg0: i32, %arg1: i32) -> (i32, i32, i32, i32) {
    %c0_i32 = arith.constant 0 : i32
    %c0_i32_0 = arith.constant 0 : i32
    %c0_i32_1 = arith.constant 0 : i32
    return %arg0, %arg1, %c0_i32, %c0_i32_0 : i32, i32, i32, i32
  }
}

</mosaic_0001>

<bundles_post_ra>
// kernel: tpu_custom_call.1
= control target key start
LH: loop header
LB: loop body
LE: loop exit
PB: predicated region body
PF: predicated region fallthrough
CT: control target
= control target key end

     0   :  { %7 = vsyncpa [#allocation3], 0  ;;  %s844_s0 = inlined_call_operand.hbm [shape: f32[2,4,2,128], index: 0, kind: input, shape index: {}]   ;;  %s845_s1 = inlined_call_operand.hbm [shape: s32[2,2,128], index: 1, kind: input, shape index: {}]   ;;  %s846_s2 = inlined_call_operand.hbm [shape: f32[2,1,2,128], index: 2, kind: output, shape index: {}]  }
   0x1   :  { %9 = vsyncpa [#allocation3 + $0x1], 0 }
   0x2   :  { %10 = vsyncpa [#allocation6], 0 }
   0x3   :  { %12 = vsyncpa [#allocation6 + $0x1], 0 }
   0x4   :  { %13 = vsyncpa [#allocation4], 0 }
   0x5   :  { %15 = vsyncpa [#allocation4 + $0x1], 0  ;;  %s672_s9 = smov 0   ;;  %s674_s10 = smov 0  }
   0x6   :  { %s676_s11 = smov 0   ;;  %s678_s12 = smov 0  }
   0x7   :  { %s680_s13 = smov 0   ;;  %s682_s14 = smov 0  }
   0x8 LB: > { %s408_s15 = sadd.s32 4294967295, %s650_s14   ;;  %s409_s16 = sadd.s32 4294967294, %s650_s14   ;;  %s650_s14 = sphi %s682_s14, %s21_s14   ;;  %s646_s13 = sphi %s680_s13, %s858_s13   ;;  %s642_s12 = sphi %s678_s12, %s857_s12   ;;  %s638_s11 = sphi %s676_s11, %s856_s11   ;;  %s634_s10 = sphi %s674_s10, %s855_s10   ;;  %s630_s9 = sphi %s672_s9, %s854_s9  }
   0x9   : > { %s33_s17 = sadd.s32 1, %s646_s13  ;;  %s42_s18 = sadd.s32 1, %s638_s11 }
   0xa   : > { %p35_p0 = scmp.ge.s32.totalorder %s33_s17, 2  ;;  %p49_p1 = scmp.ne.s32.totalorder %s638_s11, %s634_s10 }
   0xb   : > { %p50_p2 = scmp.eq.s32.totalorder %s650_s14, 0  ;;  %p55_p3 = scmp.ne.s32.totalorder %s634_s10, %s630_s9 }
   0xc   : > { %s860_s17 = smov (%p35_p0, %s33_s17), 0  ;;  %p56_p5 = scmp.eq.s32.totalorder %s408_s15, 0 }
   0xd   : > { %p713_p4 = por %p50_p2, %p49_p1  ;;  %s37_s20 = ssub.s32 %s646_s13, %s860_s17 }
   0xe   : > { %p109_p6 = scmp.eq.s32.totalorder %s408_s15, 1  ;;  %p40_p7 = scmp.eq.s32.totalorder %s37_s20, 0 }
   0xf   : > { %p719_p8 = por %p56_p5, %p55_p3  ;;  %p115_p10 = scmp.eq.s32.totalorder %s409_s16, 1 }
  0x10   : > { %p723_p9 = por %p109_p6, %p49_p1  ;;  %p446_p13 = scmp.lt.s32.totalorder %s650_s14, 2 }
  0x11   : > { %s728_s23 = scalar_select %p40_p7, %s638_s11, %s42_s18  }
  0x12   : > { %p730_p11 = por %p115_p10, %p55_p3  ;;  %s737_s25 = sand.u32 1, %s638_s11  }
  0x13   : > { %s412_s26 = sshll.u32 %s737_s25, 3  ;;  %s428_s27 = sshll.u32 %s646_s13, 7 }
  0x14   : > { %s146_s30 = scalar_lea.hbm %s844_s0, %s428_s27  ;;  %s139_s3 = scalar_lea.vmem [#allocation2], %s412_s26 }
  0x15   : > { %s147_s4 = sshll.u32 %s139_s3, 4  ;;  %p746_p0 = pnand %p446_p13, %p713_p4  ;;  %s148_s4 = int_to_ptr.vmem [resolvable:$true] %s147_s4 }
  0x16   : > { %p417_p1 = scmp.ge.s32.totalorder %s650_s14, 1  ;;  %s136_s6 = scalar_lea.sflag [#allocation3], %s737_s25 }
  0x17   : > { %p512_p2 = pneg %p746_p0  ;;  %s523_s7 = scalar_lea.vmem %s148_s4, 128 }
  0x18   : > { %p524_p3 = scmp.ne.s32.totalorder %s148_s4, %s523_s7  ;;  %s652_s8 = smov [#allocation2]  }
  0x19   : > { %s528_s15 = sshll.u32 %s652_s8, 4  ;;  %s529_s15 = int_to_ptr.vmem [resolvable:$false] %s528_s15 }
  0x1a   : > { %p526_p5 = pnand %p524_p3, %p512_p2  ;;  %s530_s16 = scalar_lea.vmem %s529_s15, 256 }
  0x1b   : > { %p531_p4 = scmp.lt.s32.totalorder %s148_s4, %s529_s15  ;;  %p532_p7 = scmp.lt.s32.totalorder %s530_s16, %s523_s7 }
  0x1c   : > { %p527_p6 = pneg %p526_p5 }
  0x1d   : > { %p533_p10 = por %p532_p7, %p531_p4 }
  0x1f   : > { %p534_p13 = pnand %p533_p10, %p527_p6 }
  0x21   : > { %537 = shalt.err (!%p534_p13)
}
  0x22   : > { %s653_s18 = smov 32   ;;  %s654_s19 = smov 2  }
  0x23   : > { %438 = dma.hbm_to_vmem [thread:$0]  (!%p746_p0), %s146_s30, 128, %s148_s4, %s136_s6, %s653_s18, %s653_s18, %s654_s19  }
  0x24   : > { %p174_p3 = scmp.lt.s32.totalorder %s650_s14, 3  ;;  %s415_s20 = sshll.u32 %s737_s25, 1 }
  0x25   : > { %s416_s26 = sshll.u32 %s646_s13, 5  ;;  %s161_s7 = scalar_lea.vmem [#allocation5], %s415_s20 }
  0x26   : > { %p764_p5 = pnand %p417_p1, %p174_p3  ;;  %s167_s3 = scalar_lea.hbm %s845_s1, %s416_s26 }
  0x27   : > { %s169_s8 = sshll.u32 %s161_s7, 4  ;;  %s158_s15 = scalar_lea.sflag [#allocation6], %s737_s25  ;;  %s170_s8 = int_to_ptr.vmem [resolvable:$true] %s169_s8 }
  0x28   : > { %s551_s16 = scalar_lea.vmem %s170_s8, 32  ;;  %s655_s30 = smov [#allocation5]  }
  0x29   : > { %p552_p6 = scmp.ne.s32.totalorder %s170_s8, %s551_s16  ;;  %s556_s4 = sshll.u32 %s655_s30, 4  ;;  %s557_s4 = int_to_ptr.vmem [resolvable:$false] %s556_s4 }
  0x2a   : > { %s558_s6 = scalar_lea.vmem %s557_s4, 64  ;;  %p559_p1 = scmp.lt.s32.totalorder %s170_s8, %s557_s4 }
  0x2b   : > { %p554_p4 = pnand %p552_p6, %p512_p2  ;;  %p560_p10 = scmp.lt.s32.totalorder %s558_s6, %s551_s16 }
  0x2d   : > { %p555_p7 = pneg %p554_p4  ;;  %p561_p13 = por %p560_p10, %p559_p1 }
  0x2f   : > { %p562_p3 = pnand %p561_p13, %p555_p7 }
  0x31   : > { %565 = shalt.err (!%p562_p3)
}
  0x32   : > { %441 = dma.hbm_to_vmem [thread:$0]  (!%p746_p0), %s167_s3, 32, %s170_s8, %s158_s15  }
  0x33   : > { %178 = sbr.rel (%p764_p5) target bundleno = 131 (0x83), region = 28  ;;  %s780_s25 = sand.u32 (!%p764_p5), 1, %s634_s10  }
  0x34   : > { %s418_s18 = sshll.u32 (!%p764_p5), %s780_s25, 3  ;;  %s181_s19 = scalar_lea.sflag (!%p764_p5), [#allocation3], %s780_s25 }
  0x35   : > { %s184_s20 = scalar_lea.vmem (!%p764_p5), [#allocation2], %s418_s18 }
  0x38   : > { %617 = dma.done.wait (%p719_p8), %s181_s19, 128  }
  0x39   : > { %619 = vsyncadd (%p719_p8), %s181_s19, 4294967168  ;;  %s419_s5 = sshll.u32 %s780_s25, 1  ;;  %s190_s26 = scalar_lea.sflag [#allocation6], %s780_s25 }
  0x3a   : > { %s193_s27 = scalar_lea.vmem [#allocation5], %s419_s5 }
  0x3b   : > { %621 = dma.done.wait (%p719_p8), %s190_s26, 32  }
  0x3c   : > { %623 = vsyncadd (%p719_p8), %s190_s26, 4294967264  ;;  %v228_v0 = vld [vmem:[%s184_s20] sm:$0x3]  ;;  %v421_v1 = vld [vmem:[%s184_s20 + $0x2] sm:$0x3]  ;;  %v221_v32 = vlaneseq  ;;  %s218_s21 = scalar_lea.vmem [#allocation7], %s419_s5 }
  0x3d   : > { %v231_v2 = vmax.f32 %v228_v0, %v421_v1  ;;  %v422_v3 = vld [vmem:[%s184_s20 + $0x4] sm:$0x3]  ;;  %v423_v4 = vld [vmem:[%s184_s20 + $0x6] sm:$0x3]  ;;  %v219_v18 = vld [vmem:[%s193_s27] sm:$0x3] }
  0x3e   : > { %vm242_vm0 = vcmp.eq.s32.totalorder %v219_v18, 0  ;;  %vm251_vm1 = vcmp.eq.s32.totalorder %v219_v18, 1  ;;  %vm260_vm2 = vcmp.eq.s32.totalorder %v219_v18, 2  ;;  %vm269_vm3 = vcmp.eq.s32.totalorder %v219_v18, 3  ;;  %s303_s28 = sshll.u32 %s218_s21, 4  ;;  %s425_s29 = sshll.u32 %s642_s12, 5  ;;  %s799_s28 = int_to_ptr.vmem [resolvable:$true] %s303_s28 }
  0x3f   : > { %v234_v5 = vmax.f32 %v231_v2, %v422_v3  ;;  %v245_v25 = vsel %vm242_vm0, %v228_v0, 0.0  ;;  %v254_v27 = vsel %vm251_vm1, %v421_v1, 0.0  ;;  %v263_v31 = vsel %vm260_vm2, %v422_v3, 0.0  ;;  %s301_s8 = scalar_lea.hbm %s846_s2, %s425_s29  ;;  %s289_s15 = scalar_lea.sflag [#allocation4], %s780_s25 }
  0x40   : > { %v255_v29 = vadd.f32 %v254_v27, %v245_v25  ;;  %v272_v36 = vsel %vm269_vm3, %v423_v4, 0.0  ;;  %v222_v37 = vshrl.u32 %v221_v32, 7  ;;  %vm226_vm5 = vcmp.ne.s32.totalorder %v219_v18, 0  ;;  %s566_s16 = scalar_lea.vmem %s799_s28, 32  ;;  %s656_s12 = smov [#allocation7]  }
  0x41   : > { %v237_v6 = vmax.f32 %v234_v5, %v423_v4  ;;  %p567_p8 = scmp.ne.s32.totalorder %s799_s28, %s566_s16  ;;  %s570_s30 = sshll.u32 %s656_s12, 4  ;;  %s571_s30 = int_to_ptr.vmem [resolvable:$false] %s570_s30 }
  0x42   : > { %v264_v34 = vadd.f32 %v263_v31, %v255_v29  ;;  %vm225_vm4 = vcmp.lt.s32.totalorder %v222_v37, 2  ;;  %s572_s4 = scalar_lea.vmem %s571_s30, 64  ;;  %p573_p5 = scmp.lt.s32.totalorder %s799_s28, %s571_s30 }
  0x43   : > { %v238_v7 = vsub.f32 %v228_v0, %v237_v6  ;;  %v247_v8 = vsub.f32 %v421_v1, %v237_v6  ;;  %v256_v9 = vsub.f32 %v422_v3, %v237_v6  ;;  %v265_v10 = vsub.f32 %v423_v4, %v237_v6  ;;  %vm227_vm6 = vmand %vm225_vm4, %vm226_vm5  ;;  %p568_p0 = pnand %p567_p8, %p723_p9  ;;  %p574_p6 = scmp.lt.s32.totalorder %s572_s4, %s566_s16 }
  0x44   : > { %v273_v40 = vadd.f32 %v272_v36, %v264_v34 }
  0x45   : > { %v239_v11 = vmul.f32 1.442695, %v238_v7  ;;  %v248_v12 = vmul.f32 1.442695, %v247_v8  ;;  %v257_v13 = vmul.f32 1.442695, %v256_v9  ;;  %p569_p2 = pneg %p568_p0  ;;  %p575_p4 = por %p574_p6, %p573_p5 }
  0x46   : > { %v266_v14 = vmul.f32 1.442695, %v265_v10 }
  0x47   : > { %498 = vpow2.f32 %v239_v11  ;;  %p576_p7 = pnand %p575_p4, %p569_p2 }
  0x48   : > { %500 = vpow2.f32 %v248_v12 }
  0x49   : > { %502 = vpow2.f32 %v257_v13 }
  0x4a   : > { %504 = vpow2.f32 %v266_v14 }
  0x54   : > { %v499_v15 = vpop.eup %498 }
  0x55   : > { %v501_v16 = vpop.eup %500  ;;  %v243_v23 = vsel %vm242_vm0, %v499_v15, 0.0 }
  0x56   : > { %v503_v17 = vpop.eup %502  ;;  %v250_v19 = vadd.f32 %v501_v16, %v499_v15  ;;  %v252_v24 = vsel %vm251_vm1, %v501_v16, 0.0 }
  0x57   : > { %v505_v20 = vpop.eup %504  ;;  %v253_v26 = vadd.f32 %v252_v24, %v243_v23  ;;  %v261_v28 = vsel %vm260_vm2, %v503_v17, 0.0 }
  0x58   : > { %v259_v21 = vadd.f32 %v503_v17, %v250_v19  ;;  %v270_v33 = vsel %vm269_vm3, %v505_v20, 0.0 }
  0x59   : > { %v262_v30 = vadd.f32 %v261_v28, %v253_v26 }
  0x5a   : > { %v268_v22 = vadd.f32 %v505_v20, %v259_v21 }
  0x5b   : > { %v271_v35 = vadd.f32 %v270_v33, %v262_v30 }
  0x5c   : > { %506 = vlog2.f32 %v268_v22 }
  0x5d   : > { %508 = vrcp.f32 %v268_v22 }
  0x69   : > { %v507_v38 = vpop.eup %506 }
  0x6a   : > { %v509_v39 = vpop.eup %508  ;;  %v275_v41 = vmul.f32 0.6931472, %v507_v38 }
  0x6b   : > { %v281_v42 = vmul.f32 %v509_v39, %v271_v35 }
  0x6c   : > { %v276_v43 = vadd.f32 %v275_v41, %v237_v6 }
  0x6d   : > { %v282_v44 = vsub.f32 1.0, %v281_v42 }
  0x6e   : > { %v277_v45 = vsub.f32 %v276_v43, %v273_v40 }
  0x6f   : > { %v283_v46 = vmul.f32 %v282_v44, %v282_v44 }
  0x70   : > { %v278_v47 = vmax.f32 %v277_v45, 0.0 }
  0x71   : > { %v284_v48 = vmul.f32 0.5, %v283_v46 }
  0x72   : > { %v279_v49 = vsel %vm227_vm6, %v278_v47, 0.0 }
  0x73   : > { %v285_v50 = vmul.f32 %v284_v48, %v279_v49 }
  0x75   : > { %v286_v51 = vsel %vm227_vm6, %v285_v50, 0.0 }
  0x76   : > { %287 = vst [vmem:[%s218_s21] sm:$0x3] %v286_v51 }
  0x77   : > { %579 = shalt.err (!%p576_p7)
}
  0x78   : > { %s580_s6 = scalar_lea.hbm %s301_s8, 32  ;;  %s584_s19 = scalar_lea.hbm %s846_s2, 64 }
  0x79   : > { %p581_p1 = scmp.ne.s32.totalorder %s301_s8, %s580_s6  ;;  %p585_p3 = scmp.lt.s32.totalorder %s301_s8, %s846_s2 }
  0x7a   : > { %p586_p8 = scmp.lt.s32.totalorder %s584_s19, %s580_s6 }
  0x7b   : > { %p582_p10 = pnand %p581_p1, %p723_p9 }
  0x7c   : > { %p587_p0 = por %p586_p8, %p585_p3 }
  0x7d   : > { %p583_p13 = pneg %p582_p10 }
  0x7f   : > { %p588_p12 = pnand %p587_p0, %p583_p13 }
  0x81   : > { %591 = shalt.err (!%p588_p12)
}
  0x82   : > { %433 = dma.vmem_to_hbm [thread:$0]  (%p723_p9), %s799_s28, 32, %s301_s8, %s289_s15  }
  0x83 PF: > { %s315_s26 = sand.u32 1, %s630_s9   ;;  %p853_p2 = scmp.ge.s32.totalorder %s650_s14, 2 }
  0x84   : > { %s316_s27 = scalar_lea.sflag [#allocation4], %s315_s26 }
  0x85   : > { %p443_p5 = pnand %p853_p2, %p730_p11 }
  0x87   : > { %p444_p6 = pneg %p443_p5 }
  0x89   : > { %625 = dma.done.wait (%p444_p6), %s316_s27, 32  }
  0x8a   : > { %627 = vsyncadd (%p444_p6), %s316_s27, 4294967264  ;;  %s21_s14 = sadd.s32 1, %s650_s14   ;;  %s854_s9 = smov %s634_s10 }
  0x8b   : > { %p18_p4 = scmp.ge.s32.totalorder %s21_s14, 4   ;;  %s855_s10 = smov %s638_s11 }
  0x8c   : > { %s856_s11 = smov %s728_s23  ;;  %s857_s12 = smov %s646_s13 }
  0x8d   : > { %s858_s13 = smov %s860_s17  ;;  %20 = sbr.rel (!%p18_p4) target bundleno = 8 (0x8), region = 89 }
  0x92   :  { %321 = vsyncpa [#allocation3], 1 }
  0x93   :  { %323 = vsyncpa [#allocation3 + $0x1], 1 }
  0x94   :  { %324 = vsyncpa [#allocation6], 1 }
  0x95   :  { %326 = vsyncpa [#allocation6 + $0x1], 1 }
  0x96   :  { %327 = vsyncpa [#allocation4], 1 }
  0x97   :  { %329 = vsyncpa [#allocation4 + $0x1], 1 }

</bundles_post_ra>
